<compile_context>
chip_gen: v7x
topology: tpu7x:2x2x1
jax: 0.10.0
libtpu: 0.0.40
codegen_flags: <defaults>
</compile_context>

<pallas_src>
import re

import jax
import jax.numpy as jnp
from jax import lax
from jax.experimental import pallas as pl
from jax.experimental.pallas import tpu as pltpu

_CONTRACT_SUBLANE = (((0,), (0,)), ((), ()))   # contract axis 0 of both operands
_CONTRACT_LANE = (((1,), (1,)), ((), ()))      # contract axis 1 (lane) of both operands


def _tpu_generation():
    try:
        kind = jax.devices()[0].device_kind
    except Exception:
        return 0
    m = re.search(r"(\d+)", str(kind))
    return int(m.group(1)) if m else 0


def _vmem_capacity_bytes():
    try:
        cap = getattr(pltpu.get_tpu_info(), "vmem_capacity_bytes", None)
        if cap:
            return int(cap)
    except Exception:
        pass
    # fallback: v7x has 64 MiB / TC, earlier generations 128 MiB.
    return (64 << 20) if _tpu_generation() >= 7 else (128 << 20)


def _pick_block_rows(n, target=512):
    """Largest divisor of n that is <= target and a multiple of 8 (prefer x128)."""
    best = None
    for bn in range(8, min(target, n) + 1, 8):
        if n % bn:
            continue
        if bn % 128 == 0:
            best = bn
        elif best is None or best % 128 != 0:
            best = bn
    return best


def _build_kernel(C, C4, N, mxu_dtype, exp_dtype, block_rows):
    """Returns (kernel_fn, scratch_shapes)."""
    f32 = jnp.float32
    same_exp_mxu = jnp.dtype(exp_dtype) == jnp.dtype(mxu_dtype)

    if block_rows is None:
        # ---------------- un-tiled path: whole (N, N) energy resident ----------------
        def kernel(x_ref, wqv_ref, wtf_ref, pvec_ref, o_ref):
            x = x_ref[...]                                                # (C, N) f32
            # fused q/v projection
            qv = jnp.dot(wqv_ref[...], x.astype(mxu_dtype),
                         preferred_element_type=f32)                      # (C4+C, N)
            q = qv[:C4, :]
            v = qv[C4:, :] + pvec_ref[:, 0:1]                             # (+ bv)
            qm = q.astype(mxu_dtype)
            # energy[n, m] = sum_c q[c, n] q[c, m]   (symmetric; no q.T relayout)
            energy = lax.dot_general(qm, qm, _CONTRACT_SUBLANE,
                                     preferred_element_type=f32)          # (N, N)
            # colmax == rowmax by symmetry (MXU rounding asymmetry only perturbs the
            # shift, which softmax is invariant to).
            colmax = jnp.max(energy, axis=0, keepdims=True)               # (1, N)
            g = jnp.exp((energy - colmax).astype(exp_dtype))              # numerator^T
            row_sum = jnp.sum(g, axis=0, keepdims=True, dtype=f32)        # f32 accumulation
            r = pl.reciprocal(row_sum, approx=True)                       # (1, N) EUP
            # fused x_r / col_sum matmul: last row of vr_aug carries r.
            vr_aug = jnp.concatenate([v * r, r], axis=0).astype(mxu_dtype)  # (C+1, N)
            gm = g if same_exp_mxu else g.astype(mxu_dtype)
            res = lax.dot_general(vr_aug, gm, _CONTRACT_LANE,
                                  preferred_element_type=f32)             # (C+1, N)
            x_r = res[:C, :] * pl.reciprocal(1e-9 + res[C:C + 1, :], approx=True)
            # trans_conv + BN(eval) + bias folded into (Wt_f, shift)
            t = jnp.dot(wtf_ref[...], (x - x_r).astype(mxu_dtype),
                        preferred_element_type=f32) + pvec_ref[:, 1:2]
            o_ref[...] = (x + jnp.maximum(t, 0.0)).astype(o_ref.dtype)

        return kernel, ()

    # ---------------- row-block tiled path: stream (bn, N) energy blocks ----------------
    bn = block_rows
    nblk = N // bn

    def kernel(x_ref, wqv_ref, wtf_ref, pvec_ref, o_ref, q_scr):
        x = x_ref[...]                                                    # (C, N) f32
        qv = jnp.dot(wqv_ref[...], x.astype(mxu_dtype),
                     preferred_element_type=f32)                          # (C4+C, N)
        q_scr[...] = qv[:C4, :].astype(mxu_dtype)                         # resident q (scratch)
        qm = q_scr[...]
        v = qv[C4:, :] + pvec_ref[:, 0:1]                                 # (C, N)

        # ---- pass 1: online (rescaled) per-point softmax max / denominator ----
        def p1(i, carry):
            m_run, l_run = carry
            off = pl.multiple_of(i * bn, bn)
            q_blk = q_scr[:, pl.ds(off, bn)]                              # (C4, bn)
            e_blk = lax.dot_general(q_blk, qm, _CONTRACT_SUBLANE,
                                    preferred_element_type=f32)           # (bn, N)
            m_new = jnp.maximum(m_run, jnp.max(e_blk, axis=0, keepdims=True))
            g_blk = jnp.exp((e_blk - m_new).astype(exp_dtype))
            l_new = (l_run * jnp.exp(m_run - m_new)
                     + jnp.sum(g_blk, axis=0, keepdims=True, dtype=f32))
            return m_new, l_new

        m0 = jnp.full((1, N), -1e30, f32)
        l0 = jnp.zeros((1, N), f32)
        colmax, row_sum = lax.fori_loop(0, nblk, p1, (m0, l0))
        r = pl.reciprocal(row_sum, approx=True)                           # (1, N)

        vr_aug = jnp.concatenate([v * r, r], axis=0).astype(mxu_dtype)    # (C+1, N)
        wtf = wtf_ref[...]
        shift = pvec_ref[:, 1:2]

        # ---- pass 2: per output-column block -> attend, trans, ReLU, residual ----
        @pl.loop(0, nblk)
        def _(i):
            off = pl.multiple_of(i * bn, bn)
            q_blk = q_scr[:, pl.ds(off, bn)]                              # (C4, bn)
            e_blk = lax.dot_general(q_blk, qm, _CONTRACT_SUBLANE,
                                    preferred_element_type=f32)           # (bn, N)
            g_blk = jnp.exp((e_blk - colmax).astype(exp_dtype))
            gm = g_blk if same_exp_mxu else g_blk.astype(mxu_dtype)
            res = lax.dot_general(vr_aug, gm, _CONTRACT_LANE,
                                  preferred_element_type=f32)             # (C+1, bn)
            x_r = res[:C, :] * pl.reciprocal(1e-9 + res[C:C + 1, :], approx=True)
            x_blk = x_ref[:, pl.ds(off, bn)]
            t = jnp.dot(wtf, (x_blk - x_r).astype(mxu_dtype),
                        preferred_element_type=f32) + shift
            o_ref[:, pl.ds(off, bn)] = (x_blk + jnp.maximum(t, 0.0)).astype(o_ref.dtype)

    return kernel, (pltpu.VMEM((C4, N), mxu_dtype),)


def sa_layer(x, wq, wv, bv, wt, bt, gamma, beta, mean, var, *,
             eps=1e-5, mxu_dtype=jnp.bfloat16, block_rows=None):
    """SA_Layer forward (BatchNorm in eval mode, running stats folded host-side).

    mxu_dtype:  dtype of MXU operands inside the kernel (accumulation is always f32).
                bf16 is the fast path; pass jnp.float32 for a strict f32 check.
    block_rows: None -> automatic ((N,N) resident when it fits VMEM, else row-block
                tiled); an int multiple of 8 dividing N forces the tiled path.
    """
    B, C, N = x.shape
    C4 = wq.shape[0]
    f32 = jnp.float32
    mxu_dtype = jnp.dtype(mxu_dtype)

    # bf16 exp only where the EUP supports it (v6e/v7x); v5e and older keep f32 exp.
    gen = _tpu_generation()
    exp_dtype = jnp.bfloat16 if (mxu_dtype == jnp.dtype(jnp.bfloat16) and gen >= 6) else f32

    # Host-side parameter folding (O(C^2), once per call / constant-folded under jit).
    scale = gamma.astype(f32) * lax.rsqrt(var.astype(f32) + eps)              # (C,)
    wqv = jnp.concatenate([wq, wv], axis=0).astype(mxu_dtype)                 # (C4+C, C)
    wt_f = (wt.astype(f32) * scale[:, None]).astype(mxu_dtype)                # (C, C)
    shift = scale * (bt.astype(f32) - mean.astype(f32)) + beta.astype(f32)
    pvec = jnp.stack([bv.astype(f32), shift], axis=1)                         # (C, 2): [bv|shift]

    # Generation-aware VMEM budget + tiling decision.
    cap = _vmem_capacity_bytes()
    budget = int(cap * 0.85)
    mxu_sz = mxu_dtype.itemsize
    exp_sz = jnp.dtype(exp_dtype).itemsize
    dup = 0 if jnp.dtype(exp_dtype) == mxu_dtype else mxu_sz
    w_bytes = mxu_sz * (C4 + 2 * C) * C + 8 * C
    io_bytes = 2 * 2 * 4 * C * N                       # double-buffered per-batch x/out blocks
    cn_bytes = 14 * 4 * C * N                          # loose bound on (C, N) temporaries
    nn_bytes = N * N * (4 + exp_sz + dup)              # energy + g (+ cast) if un-tiled
    untiled_need = int(1.5 * (nn_bytes + cn_bytes)) + io_bytes + w_bytes

    if block_rows is None and untiled_need > budget:
        block_rows = _pick_block_rows(N)               # None (e.g. awkward N) -> stay un-tiled
    if block_rows is not None:
        if N % block_rows != 0 or block_rows % 8 != 0:
            raise ValueError(f"block_rows={block_rows} must be a multiple of 8 dividing N={N}")
        nn_live = 2 * block_rows * N * (4 + exp_sz + dup)
        need = int(1.5 * (nn_live + cn_bytes + mxu_sz * C4 * N)) + io_bytes + w_bytes
    else:
        need = untiled_need
    vmem_limit = int(min(max(need, 32 << 20), budget))

    # Advisory cost estimate so XLA can schedule/overlap around this small kernel.
    n2_passes = 1 if block_rows is None else 2
    flops = B * (2 * (C4 + C) * C * N
                 + n2_passes * 2 * C4 * N * N
                 + 2 * (C + 1) * N * N
                 + 2 * C * C * N)
    cost = pl.CostEstimate(flops=int(flops),
                           transcendentals=int(B * n2_passes * N * N),
                           bytes_accessed=int(B * 2 * C * N * 4 + w_bytes))

    kernel, scratch = _build_kernel(C, C4, N, mxu_dtype, exp_dtype, block_rows)

    # NOTE: pipeline_mode=pl.Buffered(1) on the constant weight specs was considered
    # (review item) but is negligible at this C; skipped to keep lowering minimal.
    return pl.pallas_call(
        kernel,
        out_shape=jax.ShapeDtypeStruct((B, C, N), x.dtype),
        grid_spec=pltpu.PrefetchScalarGridSpec(
            num_scalar_prefetch=0,
            grid=(B,),
            in_specs=[
                pl.BlockSpec((pl.Squeezed(), C, N), lambda b: (b, 0, 0)),   # x -> (C, N) ref
                pl.BlockSpec((C4 + C, C), lambda b: (0, 0)),                # [Wq; Wv]
                pl.BlockSpec((C, C), lambda b: (0, 0)),                     # scale * Wt
                pl.BlockSpec((C, 2), lambda b: (0, 0)),                     # [bv | shift]
            ],
            out_specs=pl.BlockSpec((pl.Squeezed(), C, N), lambda b: (b, 0, 0)),
            scratch_shapes=list(scratch),
        ),
        compiler_params=pltpu.CompilerParams(
            dimension_semantics=("parallel",),
            vmem_limit_bytes=vmem_limit),
        cost_estimate=cost,
    )(x, wqv, wt_f, pvec)


def sa_layer_ref(x, wq, wv, bv, wt, bt, gamma, beta, mean, var, eps=1e-5):
    """Pure-JAX f32 reference mirroring the PyTorch forward (BN in eval mode)."""
    q = jnp.einsum('oc,bcn->bon', wq, x)                        # (B, C//4, N)
    v = jnp.einsum('oc,bcn->bon', wv, x) + bv[None, :, None]
    energy = jnp.einsum('bcn,bcm->bnm', q, q)                   # (B, N, N)
    attn = jax.nn.softmax(energy, axis=-1)
    attn = attn / (1e-9 + attn.sum(axis=1, keepdims=True))
    x_r = jnp.einsum('bcn,bnm->bcm', v, attn)
    t = jnp.einsum('oc,bcn->bon', wt, x - x_r) + bt[None, :, None]
    bn = gamma[None, :, None] * (t - mean[None, :, None]) * \
        lax.rsqrt(var[None, :, None] + eps) + beta[None, :, None]
    return x + jnp.maximum(bn, 0.0)


if __name__ == "__main__":
    C = 64
    C4 = C // 4
    key = jax.random.PRNGKey(0)
    ks = jax.random.split(key, 12)

    wq = jax.random.normal(ks[1], (C4, C), dtype=jnp.float32) * 0.1
    wv = jax.random.normal(ks[2], (C, C), dtype=jnp.float32) * 0.1
    bv = jax.random.normal(ks[3], (C,), dtype=jnp.float32) * 0.1
    wt = jax.random.normal(ks[4], (C, C), dtype=jnp.float32) * 0.1
    bt = jax.random.normal(ks[5], (C,), dtype=jnp.float32) * 0.1
    gamma = 1.0 + 0.1 * jax.random.normal(ks[6], (C,), dtype=jnp.float32)
    beta = 0.1 * jax.random.normal(ks[7], (C,), dtype=jnp.float32)
    mean = 0.1 * jax.random.normal(ks[8], (C,), dtype=jnp.float32)
    var = jnp.abs(1.0 + 0.1 * jax.random.normal(ks[9], (C,), dtype=jnp.float32))
    params = (wq, wv, bv, wt, bt, gamma, beta, mean, var)

    # ---- shape 1: B=2, N=128 (resident (N,N) fast path) ------------------------------
    B, N = 2, 128
    x = jax.random.normal(ks[0], (B, C, N), dtype=jnp.float32)
    ref = sa_layer_ref(x, *params)

    out_f32 = jax.block_until_ready(sa_layer(x, *params, mxu_dtype=jnp.float32))
    assert out_f32.shape == (B, C, N)
    err_f32 = float(jnp.max(jnp.abs(out_f32 - ref)))
    assert jnp.allclose(out_f32, ref, atol=1e-2, rtol=1e-2), \
        f"f32 kernel mismatch vs reference: max|diff|={err_f32}"

    out_bf = jax.block_until_ready(sa_layer(x, *params))
    err_bf = float(jnp.max(jnp.abs(out_bf - ref)))
    assert err_bf < 0.5, f"bf16 kernel sanity check failed: max|diff|={err_bf}"

    # ---- shape 2: B=2, N=256 with forced row-block tiling (covers the v7x path) ------
    N2 = 256
    x2 = jax.random.normal(ks[10], (B, C, N2), dtype=jnp.float32)
    ref2 = sa_layer_ref(x2, *params)

    out2_f32 = jax.block_until_ready(
        sa_layer(x2, *params, mxu_dtype=jnp.float32, block_rows=128))
    err2_f32 = float(jnp.max(jnp.abs(out2_f32 - ref2)))
    assert jnp.allclose(out2_f32, ref2, atol=1e-2, rtol=1e-2), \
        f"f32 tiled kernel mismatch vs reference: max|diff|={err2_f32}"

    out2_bf = jax.block_until_ready(sa_layer(x2, *params, block_rows=128))
    err2_bf = float(jnp.max(jnp.abs(out2_bf - ref2)))
    assert err2_bf < 0.5, f"bf16 tiled kernel sanity check failed: max|diff|={err2_bf}"

    print("KERNEL_OK")
</pallas_src>

<mosaic_0001>
module attributes {stable_mosaic.version = 11 : i64} {
  func.func @kernel(%arg0: i32, %arg1: memref<1x64x128xf32, #tpu.memory_space<vmem>>, %arg2: memref<80x64xf32, #tpu.memory_space<vmem>>, %arg3: memref<64x64xf32, #tpu.memory_space<vmem>>, %arg4: memref<64x2xf32, #tpu.memory_space<vmem>>, %arg5: memref<1x64x128xf32, #tpu.memory_space<vmem>>) attributes {dimension_semantics = [#tpu.dimension_semantics<parallel>], iteration_bounds = array<i64: 2>, scalar_prefetch = 0 : i64, scratch_operands = 0 : i64, tpu.core_type = #tpu.core_type<tc>, window_params = [{transform_indices = @transform_0, window_bounds = array<i64: 1, 64, 128>}, {pipeline_mode = #tpu.pipeline_mode<synchronous>, transform_indices = @transform_1, window_bounds = array<i64: 80, 64>}, {pipeline_mode = #tpu.pipeline_mode<synchronous>, transform_indices = @transform_2, window_bounds = array<i64: 64, 64>}, {pipeline_mode = #tpu.pipeline_mode<synchronous>, transform_indices = @transform_3, window_bounds = array<i64: 64, 2>}, {transform_indices = @transform_4, window_bounds = array<i64: 1, 64, 128>}]} {
    %c0 = arith.constant 0 : index
    %c0_0 = arith.constant 0 : index
    %c0_1 = arith.constant 0 : index
    %0 = vector.load %arg1[%c0, %c0_0, %c0_1] : memref<1x64x128xf32, #tpu.memory_space<vmem>>, vector<1x64x128xf32>
    %1 = vector.shape_cast %0 : vector<1x64x128xf32> to vector<64x128xf32>
    %c0_2 = arith.constant 0 : index
    %c0_3 = arith.constant 0 : index
    %2 = vector.load %arg2[%c0_2, %c0_3] : memref<80x64xf32, #tpu.memory_space<vmem>>, vector<80x64xf32>
    %cst = arith.constant dense<0.000000e+00> : vector<80x128xf32>
    %3 = tpu.matmul %2, %1, %cst {dimension_numbers = #tpu.dot_dimension_numbers<[1], [0], [0], [1], [0, 0, 1, 1], [], []>} : vector<80x64xf32>, vector<64x128xf32>, vector<80x128xf32> -> vector<80x128xf32>
    %4 = vector.extract_strided_slice %3 {offsets = [0, 0], sizes = [16, 128], strides = [1, 1]} : vector<80x128xf32> to vector<16x128xf32>
    %5 = vector.extract_strided_slice %3 {offsets = [16, 0], sizes = [64, 128], strides = [1, 1]} : vector<80x128xf32> to vector<64x128xf32>
    %c0_4 = arith.constant 0 : index
    %c0_5 = arith.constant 0 : index
    %6 = vector.load %arg4[%c0_4, %c0_5] : memref<64x2xf32, #tpu.memory_space<vmem>>, vector<64x1xf32>
    %7 = vector.broadcast %6 : vector<64x1xf32> to vector<64x128xf32>
    %8 = arith.addf %5, %7 : vector<64x128xf32>
    %cst_6 = arith.constant dense<0.000000e+00> : vector<128x128xf32>
    %9 = tpu.matmul %4, %4, %cst_6 {dimension_numbers = #tpu.dot_dimension_numbers<[0], [0], [1], [1], [0, 1, 1, 1], [], []>} : vector<16x128xf32>, vector<16x128xf32>, vector<128x128xf32> -> vector<128x128xf32>
    %cst_7 = arith.constant dense<0xFF800000> : vector<128xf32>
    %10 = vector.multi_reduction <maximumf>, %9, %cst_7 [0] : vector<128x128xf32> to vector<128xf32>
    %11 = vector.shape_cast %10 : vector<128xf32> to vector<1x128xf32>
    %12 = vector.broadcast %11 : vector<1x128xf32> to vector<128x128xf32>
    %13 = arith.subf %9, %12 : vector<128x128xf32>
    %14 = math.exp %13 : vector<128x128xf32>
    %cst_8 = arith.constant dense<0.000000e+00> : vector<128xf32>
    %15 = vector.multi_reduction <add>, %14, %cst_8 [0] : vector<128x128xf32> to vector<128xf32>
    %16 = vector.shape_cast %15 : vector<128xf32> to vector<1x128xf32>
    %17 = tpu.reciprocal %16 {approx = true} : vector<1x128xf32> -> vector<1x128xf32>
    %18 = vector.broadcast %17 : vector<1x128xf32> to vector<64x128xf32>
    %19 = arith.mulf %8, %18 : vector<64x128xf32>
    %20 = tpu.concatenate %19, %17 in 0 : vector<64x128xf32>, vector<1x128xf32> -> vector<65x128xf32>
    %cst_9 = arith.constant dense<0.000000e+00> : vector<65x128xf32>
    %21 = tpu.matmul %20, %14, %cst_9 {dimension_numbers = #tpu.dot_dimension_numbers<[1], [1], [0], [0], [0, 0, 1, 0], [], []>} : vector<65x128xf32>, vector<128x128xf32>, vector<65x128xf32> -> vector<65x128xf32>
    %22 = vector.extract_strided_slice %21 {offsets = [0, 0], sizes = [64, 128], strides = [1, 1]} : vector<65x128xf32> to vector<64x128xf32>
    %23 = vector.extract_strided_slice %21 {offsets = [64, 0], sizes = [1, 128], strides = [1, 1]} : vector<65x128xf32> to vector<1x128xf32>
    %cst_10 = arith.constant 9.99999971E-10 : f32
    %24 = vector.broadcast %cst_10 : f32 to vector<1x128xf32>
    %25 = arith.addf %24, %23 : vector<1x128xf32>
    %26 = tpu.reciprocal %25 {approx = true} : vector<1x128xf32> -> vector<1x128xf32>
    %27 = vector.broadcast %26 : vector<1x128xf32> to vector<64x128xf32>
    %28 = arith.mulf %22, %27 : vector<64x128xf32>
    %c0_11 = arith.constant 0 : index
    %c0_12 = arith.constant 0 : index
    %29 = vector.load %arg3[%c0_11, %c0_12] : memref<64x64xf32, #tpu.memory_space<vmem>>, vector<64x64xf32>
    %30 = arith.subf %1, %28 : vector<64x128xf32>
    %cst_13 = arith.constant dense<0.000000e+00> : vector<64x128xf32>
    %31 = tpu.matmul %29, %30, %cst_13 {dimension_numbers = #tpu.dot_dimension_numbers<[1], [0], [0], [1], [0, 0, 1, 1], [], []>} : vector<64x64xf32>, vector<64x128xf32>, vector<64x128xf32> -> vector<64x128xf32>
    %c0_14 = arith.constant 0 : index
    %c1 = arith.constant 1 : index
    %32 = vector.load %arg4[%c0_14, %c1] : memref<64x2xf32, #tpu.memory_space<vmem>>, vector<64x1xf32>
    %33 = vector.broadcast %32 : vector<64x1xf32> to vector<64x128xf32>
    %34 = arith.addf %31, %33 : vector<64x128xf32>
    %cst_15 = arith.constant 0.000000e+00 : f32
    %35 = vector.broadcast %cst_15 : f32 to vector<64x128xf32>
    %36 = arith.maximumf %34, %35 : vector<64x128xf32>
    %37 = arith.addf %1, %36 : vector<64x128xf32>
    %c0_16 = arith.constant 0 : index
    %c0_17 = arith.constant 0 : index
    %c0_18 = arith.constant 0 : index
    %38 = vector.load %arg5[%c0_16, %c0_17, %c0_18] : memref<1x64x128xf32, #tpu.memory_space<vmem>>, vector<1x64x128xf32>
    %39 = vector.shape_cast %38 : vector<1x64x128xf32> to vector<64x128xf32>
    %40 = vector.shape_cast %37 : vector<64x128xf32> to vector<1x64x128xf32>
    tpu.vector_store %arg5[%c0_16, %c0_17, %c0_18], %40 {strides = array<i32>} : memref<1x64x128xf32, #tpu.memory_space<vmem>>, vector<1x64x128xf32>,
    return
  }
  func.func @transform_0(%arg0: i32) -> (i32, i32, i32) {
    %c0_i32 = arith.constant 0 : i32
    %c0_i32_0 = arith.constant 0 : i32
    %c0_i32_1 = arith.constant 0 : i32
    return %arg0, %c0_i32, %c0_i32_0 : i32, i32, i32
  }
  func.func @transform_1(%arg0: i32) -> (i32, i32) {
    %c0_i32 = arith.constant 0 : i32
    %c0_i32_0 = arith.constant 0 : i32
    %c0_i32_1 = arith.constant 0 : i32
    return %c0_i32, %c0_i32_0 : i32, i32
  }
  func.func @transform_2(%arg0: i32) -> (i32, i32) {
    %c0_i32 = arith.constant 0 : i32
    %c0_i32_0 = arith.constant 0 : i32
    %c0_i32_1 = arith.constant 0 : i32
    return %c0_i32, %c0_i32_0 : i32, i32
  }
  func.func @transform_3(%arg0: i32) -> (i32, i32) {
    %c0_i32 = arith.constant 0 : i32
    %c0_i32_0 = arith.constant 0 : i32
    %c0_i32_1 = arith.constant 0 : i32
    return %c0_i32, %c0_i32_0 : i32, i32
  }
  func.func @transform_4(%arg0: i32) -> (i32, i32, i32) {
    %c0_i32 = arith.constant 0 : i32
    %c0_i32_0 = arith.constant 0 : i32
    %c0_i32_1 = arith.constant 0 : i32
    return %arg0, %c0_i32, %c0_i32_0 : i32, i32, i32
  }
}

</mosaic_0001>

<bundles_post_ra>
// kernel: tpu_custom_call.1
= control target key start
LH: loop header
LB: loop body
LE: loop exit
PB: predicated region body
PF: predicated region fallthrough
CT: control target
= control target key end

     0   :  { %9 = vsyncpa [#allocation3], 0  ;;  %s2100_s0 = inlined_call_operand.vmem [shape: f32[2,64,128], index: 0, kind: input, shape index: {}]   ;;  %s2101_s1 = inlined_call_operand.vmem [shape: f32[80,64], index: 1, kind: input, shape index: {}]   ;;  %s2102_s2 = inlined_call_operand.hbm [shape: f32[64,64], index: 2, kind: input, shape index: {}]   ;;  %s2103_s3 = inlined_call_operand.vmem [shape: f32[64,2], index: 3, kind: input, shape index: {}]   ;;  %s2104_s4 = inlined_call_operand.hbm [shape: f32[2,64,128], index: 4, kind: output, shape index: {}]  }
   0x1   :  { %10 = vsyncpa [#allocation4], 0 }
   0x2   :  { %12 = vsyncpa [#allocation4 + $0x1], 0  ;;  %s1733_s15 = smov 0   ;;  %s1735_s16 = smov 0  }
   0x3   :  { %s1737_s17 = smov 0   ;;  %s1739_s18 = smov 0  }
   0x4 LB: > { %s1754_s19 = sadd.s32 4294967295, %s1695_s18   ;;  %s1169_s20 = sadd.s32 4294967294, %s1695_s18   ;;  %s1695_s18 = sphi %s1739_s18, %s2123_s18   ;;  %s1691_s17 = sphi %s1737_s17, %s2122_s17   ;;  %s1687_s16 = sphi %s1735_s16, %s2121_s16   ;;  %s1683_s15 = sphi %s1733_s15, %s2120_s15  }
   0x5   : > { %s1758_s21 = sadd.s32 1, %s1695_s18   ;;  %s114_s22 = sadd.s32 1, %s1691_s17 }
   0x6   : > { %s111_s23 = ssub.s32 %s1695_s18, %s1758_s21  ;;  %p124_p0 = scmp.ne.s32.totalorder %s1691_s17, %s1687_s16 }
   0x7   : > { %p112_p1 = scmp.eq.s32.totalorder %s111_s23, 0  ;;  %p125_p2 = scmp.eq.s32.totalorder %s1754_s19, 1 }
   0x8   : > { %p130_p3 = scmp.ne.s32.totalorder %s1687_s16, %s1683_s15  ;;  %p131_p4 = scmp.eq.s32.totalorder %s1169_s20, 1 }
   0x9   : > { %s1769_s24 = scalar_select %p112_p1, %s1691_s17, %s114_s22  }
   0xa   : > { %p1771_p5 = por %p125_p2, %p124_p0  ;;  %p1775_p6 = por %p131_p4, %p130_p3 }
   0xb   : > { %p1170_p7 = scmp.ge.s32.totalorder %s1695_s18, 1  ;;  %p138_p8 = scmp.lt.s32.totalorder %s1695_s18, 3 }
   0xc   : > { %s2110_s25 = scalar_select %p1771_p5, 1, 0 }
   0xd   : > { %s2111_s26 = scalar_select %p1775_p6, 1, 0 }
   0xe   : > { %p2105_p9 = scmp.eq.s32.totalorder %s1754_s19, 0  ;;  %p1782_p10 = pnand %p1170_p7, %p138_p8 }
   0xf   : > { %s1697_s28 = smov [#allocation2]   ;;  %s1601_s7 = scalar_lea.hbm %s2102_s2, 1024 }
  0x10   : > { %s2112_s27 = scalar_select %p1782_p10, 1, 0 }
  0x11   : > { %s153_s29 = sshll.u32 %s1697_s28, 4  ;;  %p1508_p11 = pneg %p1782_p10  ;;  %s154_s29 = int_to_ptr.vmem [resolvable:$true] %s153_s29 }
  0x12   : > { %p1602_p13 = scmp.ne.s32.totalorder %s2102_s2, %s1601_s7  ;;  %p1608_p3 = scmp.lt.u32.totalorder %s1601_s7, %s2102_s2 }
  0x13   : > { %p1790_p12 = pnand %p2105_p9, %p1508_p11 }
  0x15   : > { %p1603_p0 = pneg %p1790_p12 }
  0x17   : > { %p1604_p1 = pnand %p1603_p0, %p1602_p13 }
  0x19   : > { %p1605_p2 = pneg %p1604_p1 }
  0x1b   : > { %p1610_p4 = pnand %p1608_p3, %p1605_p2 }
  0x1d   : > { %1613 = shalt.err (!%p1610_p4)
}
  0x1e   : > { %s1614_s12 = scalar_lea.vmem %s154_s29, 1024  ;;  %p1622_p9 = scmp.lt.s32.totalorder %s154_s29, %s154_s29 }
  0x1f   : > { %p1615_p7 = scmp.ne.s32.totalorder %s154_s29, %s1614_s12  ;;  %p1623_p6 = scmp.lt.s32.totalorder %s1614_s12, %s1614_s12 }
  0x21   : > { %p1617_p8 = pnand %p1615_p7, %p1603_p0  ;;  %p1624_p5 = por %p1623_p6, %p1622_p9 }
  0x23   : > { %p1618_p11 = pneg %p1617_p8 }
  0x25   : > { %p1625_p10 = pnand %p1624_p5, %p1618_p11 }
  0x27   : > { %1628 = shalt.err (!%p1625_p10)
}
  0x28   : > { %s1698_s13 = smov 128   ;;  %s1699_s14 = smov 8  }
  0x29   : > { %1511 = dma.hbm_to_vmem [thread:$0]  (!%p1790_p12), %s2102_s2, 1024, %s154_s29, [#allocation3], %s1698_s13, %s1698_s13, %s1699_s14  }
  0x2a   : > { %p2114_p13 = scmp.ne.s32.totalorder %s2112_s27, 0 }
  0x2b   : > { %p2115_p1 = scmp.eq.s32.totalorder (!%p2114_p13), %s1754_s19, 0 }
  0x2c   : > { %180 = sbr.rel (%p2114_p13) target bundleno = 1320 (0x528), region = 36 }
  0x33   : > { %1674 = dma.done.wait (%p2115_p1), [#allocation3], 1024   ;;  %p2116_p0 = pmov %p2115_p1 }
  0x34   : > { %p206_p5 = scmp.lt.s32.totalorder %s1754_s19, 1  ;;  %vm229_vm0 = vcmask 523264   ;;  %v219_v8 = vld [vmem:[%s2101_s1] sm:$0xff]  ;;  %v220_v13 = vld [vmem:[%s2101_s1 + $0x8] sm:$0xff]  ;;  %v221_v14 = vld [vmem:[%s2101_s1 + $0x10] sm:$0xff]  ;;  %v1700_v26 = vmov 0  }
  0x35   : > { %1676 = vsyncadd (%p2116_p0), [#allocation3], 4294966272  ;;  %1312 = vmatprep.mubr.msk.f32.mxu0 %vm229_vm0, %v219_v8  ;;  %v222_v15 = vld [vmem:[%s2101_s1 + $0x18] sm:$0xff]  ;;  %v223_v16 = vld [vmem:[%s2101_s1 + $0x20] sm:$0xff]  ;;  %1561 = vset.pattern.permute.xlu1 %v1700_v26  ;;  %vm463_vm1 = vcmask 130048   ;;  %v1701_v58 = vmov 0.0|0.0  }
  0x36   : > { %s207_s23 = scalar_select %p206_p5, %s1754_s19, 1  ;;  %v224_v17 = vld [vmem:[%s2101_s1 + $0x28] sm:$0xff]  ;;  %v225_v18 = vld [vmem:[%s2101_s1 + $0x30] sm:$0xff]  ;;  %v226_v19 = vld [vmem:[%s2101_s1 + $0x38] sm:$0xff]  ;;  %1462 = vmatprep.subr.bf16.mxu1 %v1701_v58  ;;  %vm1702_vm2 = vmmov 0  }
  0x37   : > { %v227_v20 = vld [vmem:[%s2101_s1 + $0x40] sm:$0xff]  ;;  %v228_v21 = vld [vmem:[%s2101_s1 + $0x48] sm:$0xff]  ;;  %v1900_v28 = vld [vmem:[%s2103_s3 + $0x18] sm:$0xff]  ;;  %s203_s7 = sand.u32 1, %s1687_s16   ;;  %s1218_s11 = sshll.u32 %s1754_s19, 10 }
  0x38   : > { %s1217_s28 = sshll.u32 %s207_s23, 6  ;;  %v1888_v25 = vld [vmem:[%s2103_s3] sm:$0xff]  ;;  %v1894_v27 = vld [vmem:[%s2103_s3 + $0x8] sm:$0xff]  ;;  %v1918_v31 = vld [vmem:[%s2103_s3 + $0x30] sm:$0xff]  ;;  %s1175_s8 = sshll.u32 %s203_s7, 6 }
  0x39   : > { %s210_s6 = scalar_lea.vmem %s2100_s0, %s1217_s28  ;;  %385 = vperm.xlu1 %1561, %v1888_v25   ;;  %v1906_v29 = vld [vmem:[%s2103_s3 + $0x20] sm:$0xff]  ;;  %v1912_v30 = vld [vmem:[%s2103_s3 + $0x28] sm:$0xff]  ;;  %v1924_v32 = vld [vmem:[%s2103_s3 + $0x38] sm:$0xff]  ;;  %s2032_s9 = scalar_lea.vmem [#allocation5], %s1175_s8 }
  0x3a   : > { %v1821_v0 = vld [vmem:[%s210_s6] sm:$0xff]  ;;  %v1823_v1 = vld [vmem:[%s210_s6 + $0x8] sm:$0xff]  ;;  %v1825_v2 = vld [vmem:[%s210_s6 + $0x10] sm:$0xff]  ;;  %s1095_s10 = sshll.u32 %s2032_s9, 4  ;;  %s2053_s14 = scalar_lea.hbm %s2104_s4, %s1218_s11  ;;  %s2046_s10 = int_to_ptr.vmem [resolvable:$true] %s1095_s10 }
  0x3b   : > { %v1442_v3 = vpack.c.bf16 %v1823_v1, %v1821_v0  ;;  %v1829_v4 = vld [vmem:[%s210_s6 + $0x18] sm:$0xff]  ;;  %v1833_v6 = vld [vmem:[%s210_s6 + $0x20] sm:$0xff]  ;;  %v1835_v7 = vld [vmem:[%s210_s6 + $0x28] sm:$0xff]  ;;  %s2059_s19 = scalar_lea.sflag [#allocation4], %s203_s7  ;;  %s1629_s20 = scalar_lea.vmem %s2046_s10, 1024 }
  0x3c   : > { %v1446_v5 = vpack.c.bf16 %v1829_v4, %v1825_v2  ;;  %v1450_v9 = vpack.c.bf16 %v1835_v7, %v1833_v6  ;;  %v1843_v10 = vld [vmem:[%s210_s6 + $0x30] sm:$0xff]  ;;  %v1845_v11 = vld [vmem:[%s210_s6 + $0x38] sm:$0xff]  ;;  %p1630_p6 = scmp.ne.s32.totalorder %s2046_s10, %s1629_s20  ;;  %p2118_p9 = scmp.ne.s32.totalorder %s2110_s25, 0 }
  0x3d   : > { %1443 = vmatprep.subr.bf16.mxu0 %v1442_v3  ;;  %v1454_v12 = vpack.c.bf16 %v1845_v11, %v1843_v10  ;;  %390 = vperm.xlu1 %1561, %v1894_v27   ;;  %v1940_v38 = vld [vmem:[%s2103_s3 + $0x10] sm:$0xff]  ;;  %s1705_s22 = smov [#allocation5]  }
  0x3e   : > { %1445 = vmatpush3.bf16.msra.mxu0 %v1442_v3  ;;  %p1631_p10 = pnand %p1630_p6, %p2118_p9  ;;  %s1633_s23 = sshll.u32 %s1705_s22, 4  ;;  %s1634_s23 = int_to_ptr.vmem [resolvable:$false] %s1633_s23 }
  0x3f   : > { %1447 = vmatprep.subr.bf16.mxu0 %v1446_v5  ;;  %s1635_s28 = scalar_lea.vmem %s1634_s23, 2048  ;;  %p1636_p2 = scmp.lt.s32.totalorder %s2046_s10, %s1634_s23 }
  0x40   : > { %p1632_p12 = pneg %p1631_p10  ;;  %p1637_p3 = scmp.lt.s32.totalorder %s1635_s28, %s1629_s20 }
  0x41   : > { %400 = vperm.xlu1 %1561, %v1900_v28  }
  0x42   : > { %1449 = vmatpush3.bf16.msra.mxu0 %v1446_v5  ;;  %p1638_p4 = por %p1637_p3, %p1636_p2 }
  0x43   : > { %1451 = vmatprep.subr.bf16.mxu0 %v1450_v9 }
  0x44   : > { %p1639_p7 = pnand %p1638_p4, %p1632_p12 }
  0x45   : > { %405 = vperm.xlu1 %1561, %v1906_v29  }
  0x46   : > { %1453 = vmatpush3.bf16.msra.mxu0 %v1450_v9 }
  0x47   : > { %1455 = vmatprep.subr.bf16.mxu0 %v1454_v12 }
  0x49   : > { %410 = vperm.xlu1 %1561, %v1912_v30  }
  0x4a   : > { %1457 = vmatpush3.bf16.msra.mxu0 %v1454_v12 }
  0x4d   : > { %1313 = vmatmul.mubr.msk.f32.vlgmr.msra.gmra.mrb[0].mxu0 %vm229_vm0, %v220_v13  ;;  %415 = vperm.xlu1 %1561, %v1918_v31  }
  0x4e   : > { %1315 = vmatprep.mubr.msk.f32.mxu0 %vm229_vm0, %v221_v14  ;;  %v2108_v14 = vmov 0.0  }
  0x4f   : > { %1387 = vmatprep.mubr.msk.f32.mxu1 %vm1702_vm2, %v2108_v14 }
  0x51   : > { %1316 = vmatmul.mubr.msk.f32.gmra.mrb[2].mxu0 %vm229_vm0, %v222_v15  ;;  %420 = vperm.xlu1 %1561, %v1924_v32  }
  0x52   : > { %1318 = vmatprep.mubr.msk.f32.mxu0 %vm229_vm0, %v223_v16 }
  0x55   : > { %1319 = vmatmul.mubr.msk.f32.gmra.mrb[4].mxu0 %vm229_vm0, %v224_v17 }
  0x56   : > { %1321 = vmatprep.mubr.msk.f32.mxu0 %vm229_vm0, %v225_v18 }
  0x59   : > { %1322 = vmatmul.mubr.msk.f32.gmra.mrb[6].mxu0 %vm229_vm0, %v226_v19 }
  0x5a   : > { %1324 = vmatprep.mubr.msk.f32.mxu0 %vm229_vm0, %v227_v20 }
  0x5d   : > { %1325 = vmatmul.mubr.msk.f32.gmra.mrb[8].mxu0 %vm229_vm0, %v228_v21 }
 0x120   : > { %v1314_v22 = vpop.f32.mrb[0].mxu0 }
 0x121   : > { %v326_v23 = vpop.f32.mrb[1].mxu0 }
 0x122   : > { %v1458_v24 = vpack.c.bf16 %v1314_v22, %v326_v23  ;;  %431 = vxpose.xlu0.b32.start [1/2] (short) %v326_v23, 128 }
 0x124   : > { %1459 = vmatprep.subr.bf16.mxu0 %v1458_v24  ;;  %v1927_v33 = vpop.f32.mrb[2].mxu0 }
 0x125   : > { %1461 = vmatpush3.bf16.msra.mxu0 %v1458_v24  ;;  %v1929_v34 = vpop.f32.mrb[3].mxu0 }
 0x126   : > { %432 = vxpose.xlu0.b32.end [2/2] (short) %v1314_v22, 128 }
 0x128   : > { %v1931_v35 = vpop.f32.mrb[4].mxu0 }
 0x129   : > { %v1933_v36 = vpop.f32.mrb[5].mxu0 }
 0x12c   : > { %v1935_v37 = vpop.f32.mrb[6].mxu0 }
 0x12d   : > { %v1942_v39 = vpop.f32.mrb[7].mxu0 }
 0x130   : > { %v1945_v40 = vpop.f32.mrb[8].mxu0 }
 0x131   : > { %v1947_v41 = vpop.f32.mrb[9].mxu0 }
 0x14f   : > { %1562 = vset.pattern.permute.xlu0 %v1700_v26 }
 0x187   : > { %395 = vperm.xlu0 %1562, %v1940_v38  }
 0x1a2   : > { %v447_v42 = vpop.trf.xlu0 }
 0x1a3   : > { %1331 = vmatprep.mubr.msk.f32.mxu0 %vm463_vm1, %v447_v42 }
 0x1a6   : > { %v448_v43 = vpop.trf.xlu0 }
 0x1a7   : > { %1332 = vmatmul.mubr.msk.f32.vlgmr.msra.gmra.mrb[10].mxu0 %vm463_vm1, %v448_v43 }
 0x1aa   : > { %v449_v44 = vpop.trf.xlu0 }
 0x1ab   : > { %1334 = vmatprep.mubr.msk.f32.mxu0 %vm463_vm1, %v449_v44 }
 0x1ae   : > { %v450_v45 = vpop.trf.xlu0 }
 0x1af   : > { %1335 = vmatmul.mubr.msk.f32.gmra.mrb[12].mxu0 %vm463_vm1, %v450_v45 }
 0x1b2   : > { %v451_v46 = vpop.trf.xlu0 }
 0x1b3   : > { %1337 = vmatprep.mubr.msk.f32.mxu0 %vm463_vm1, %v451_v46 }
 0x1b6   : > { %v452_v47 = vpop.trf.xlu0 }
 0x1b7   : > { %1338 = vmatmul.mubr.msk.f32.gmra.mrb[14].mxu0 %vm463_vm1, %v452_v47 }
 0x1ba   : > { %v453_v48 = vpop.trf.xlu0 }
 0x1bb   : > { %1340 = vmatprep.mubr.msk.f32.mxu0 %vm463_vm1, %v453_v48 }
 0x1be   : > { %v454_v49 = vpop.trf.xlu0 }
 0x1bf   : > { %1341 = vmatmul.mubr.msk.f32.gmra.mrb[16].mxu0 %vm463_vm1, %v454_v49 }
 0x1c2   : > { %v455_v50 = vpop.trf.xlu0 }
 0x1c3   : > { %1343 = vmatprep.mubr.msk.f32.mxu0 %vm463_vm1, %v455_v50 }
 0x1c6   : > { %v456_v51 = vpop.trf.xlu0 }
 0x1c7   : > { %1344 = vmatmul.mubr.msk.f32.gmra.mrb[18].mxu0 %vm463_vm1, %v456_v51 }
 0x1ca   : > { %v457_v52 = vpop.trf.xlu0 }
 0x1cb   : > { %1346 = vmatprep.mubr.msk.f32.mxu0 %vm463_vm1, %v457_v52 }
 0x1ce   : > { %v458_v53 = vpop.trf.xlu0 }
 0x1cf   : > { %1347 = vmatmul.mubr.msk.f32.gmra.mrb[20].mxu0 %vm463_vm1, %v458_v53 }
 0x1d2   : > { %v459_v54 = vpop.trf.xlu0 }
 0x1d3   : > { %1349 = vmatprep.mubr.msk.f32.mxu0 %vm463_vm1, %v459_v54 }
 0x1d6   : > { %v460_v55 = vpop.trf.xlu0 }
 0x1d7   : > { %1350 = vmatmul.mubr.msk.f32.gmra.mrb[22].mxu0 %vm463_vm1, %v460_v55 }
 0x1da   : > { %v461_v56 = vpop.trf.xlu0 }
 0x1db   : > { %1352 = vmatprep.mubr.msk.f32.mxu0 %vm463_vm1, %v461_v56 }
 0x1de   : > { %v462_v57 = vpop.trf.xlu0 }
 0x1df   : > { %1353 = vmatmul.mubr.msk.f32.gmra.mrb[24].mxu0 %vm463_vm1, %v462_v57 }
 0x27a   : > { %v1333_v59 = vpop.f32.mrb[10].mxu0 }
 0x27b   : > { %v578_v60 = vpop.f32.mrb[11].mxu0 }
 0x282   : > { %v1336_v61 = vpop.f32.mrb[12].mxu0 }
 0x283   : > { %v588_v62 = vpop.f32.mrb[13].mxu0 }
 0x28a   : > { %v1339_v63 = vpop.f32.mrb[14].mxu0 }
 0x28b   : > { %v658_v3 = vmax.f32 %v1333_v59, %v1339_v63  ;;  %v598_v5 = vpop.f32.mrb[15].mxu0 }
 0x28c   : > { %v657_v8 = vmax.f32 %v578_v60, %v598_v5 }
 0x292   : > { %v1342_v9 = vpop.f32.mrb[16].mxu0 }
 0x293   : > { %v660_v12 = vmax.f32 %v1336_v61, %v1342_v9  ;;  %v608_v13 = vpop.f32.mrb[17].mxu0 }
 0x294   : > { %v659_v15 = vmax.f32 %v588_v62, %v608_v13 }
 0x29a   : > { %v1345_v16 = vpop.f32.mrb[18].mxu0 }
 0x29b   : > { %v662_v17 = vmax.f32 %v658_v3, %v1345_v16  ;;  %v618_v18 = vpop.f32.mrb[19].mxu0 }
 0x29c   : > { %v661_v19 = vmax.f32 %v657_v8, %v618_v18 }
 0x2a2   : > { %v1348_v20 = vpop.f32.mrb[20].mxu0 }
 0x2a3   : > { %v664_v21 = vmax.f32 %v660_v12, %v1348_v20  ;;  %v628_v22 = vpop.f32.mrb[21].mxu0 }
 0x2a4   : > { %v663_v23 = vmax.f32 %v659_v15, %v628_v22 }
 0x2aa   : > { %v1351_v24 = vpop.f32.mrb[22].mxu0 }
 0x2ab   : > { %v666_v26 = vmax.f32 %v662_v17, %v1351_v24  ;;  %v638_v42 = vpop.f32.mrb[23].mxu0 }
 0x2ac   : > { %v665_v43 = vmax.f32 %v661_v19, %v638_v42 }
 0x2ae   : > { %v669_v44 = vmax.f32 %v665_v43, %v666_v26 }
 0x2b2   : > { %v1354_v45 = vpop.f32.mrb[24].mxu0 }
 0x2b3   : > { %v668_v46 = vmax.f32 %v664_v21, %v1354_v45  ;;  %v648_v47 = vpop.f32.mrb[25].mxu0 }
 0x2b4   : > { %v667_v48 = vmax.f32 %v663_v23, %v648_v47 }
 0x2b6   : > { %v670_v49 = vmax.f32 %v667_v48, %v668_v46 }
 0x2b8   : > { %v671_v50 = vmax.f32 %v669_v44, %v670_v49 }
 0x2ba   : > { %v672_v51 = vrot.slane %v671_v50, 4 }
 0x2bc   : > { %v673_v52 = vmax.f32 %v671_v50, %v672_v51 }
 0x2be   : > { %v674_v53 = vrot.slane %v673_v52, 2 }
 0x2c0   : > { %v675_v54 = vmax.f32 %v673_v52, %v674_v53 }
 0x2c2   : > { %v676_v55 = vrot.slane %v675_v54, 1 }
 0x2c4   : > { %v677_v56 = vmax.f32 %v675_v54, %v676_v55 }
 0x2c6   : > { %v692_v57 = vsub.f32 %v648_v47, %v677_v56  ;;  %v678_v3 = vsub.f32 %v578_v60, %v677_v56  ;;  %v679_v8 = vsub.f32 %v1333_v59, %v677_v56  ;;  %v680_v12 = vsub.f32 %v588_v62, %v677_v56 }
 0x2c7   : > { %v681_v15 = vsub.f32 %v1336_v61, %v677_v56  ;;  %v682_v17 = vsub.f32 %v598_v5, %v677_v56  ;;  %v683_v19 = vsub.f32 %v1339_v63, %v677_v56  ;;  %v684_v26 = vsub.f32 %v608_v13, %v677_v56 }
 0x2c8   : > { %v722_v43 = vmul.f32 1.442695, %v692_v57  ;;  %v685_v21 = vsub.f32 %v1342_v9, %v677_v56  ;;  %v686_v14 = vsub.f32 %v618_v18, %v677_v56  ;;  %v687_v23 = vsub.f32 %v1345_v16, %v677_v56 }
 0x2c9   : > { %v688_v46 = vsub.f32 %v628_v22, %v677_v56  ;;  %v689_v44 = vsub.f32 %v1348_v20, %v677_v56  ;;  %v690_v48 = vsub.f32 %v638_v42, %v677_v56  ;;  %v691_v49 = vsub.f32 %v1351_v24, %v677_v56 }
 0x2ca   : > { %v694_v50 = vmul.f32 1.442695, %v678_v3  ;;  %v696_v51 = vmul.f32 1.442695, %v679_v8  ;;  %v698_v52 = vmul.f32 1.442695, %v680_v12  ;;  %1565 = vpow2.f32 %v722_v43 }
 0x2cb   : > { %v700_v47 = vmul.f32 1.442695, %v681_v15  ;;  %v693_v60 = vsub.f32 %v1354_v45, %v677_v56  ;;  %v702_v59 = vmul.f32 1.442695, %v682_v17  ;;  %v704_v61 = vmul.f32 1.442695, %v683_v19 }
 0x2cc   : > { %1567 = vpow2.f32 %v694_v50  ;;  %v706_v62 = vmul.f32 1.442695, %v684_v26  ;;  %v708_v63 = vmul.f32 1.442695, %v685_v21  ;;  %v710_v5 = vmul.f32 1.442695, %v686_v14 }
 0x2cd   : > { %1569 = vpow2.f32 %v696_v51  ;;  %v712_v9 = vmul.f32 1.442695, %v687_v23  ;;  %v714_v13 = vmul.f32 1.442695, %v688_v46  ;;  %v716_v16 = vmul.f32 1.442695, %v689_v44 }
 0x2ce   : > { %1571 = vpow2.f32 %v698_v52  ;;  %v718_v18 = vmul.f32 1.442695, %v690_v48  ;;  %v720_v22 = vmul.f32 1.442695, %v691_v49  ;;  %v724_v42 = vmul.f32 1.442695, %v693_v60 }
 0x2cf   : > { %1573 = vpow2.f32 %v700_v47 }
 0x2d0   : > { %1575 = vpow2.f32 %v702_v59 }
 0x2d1   : > { %1577 = vpow2.f32 %v704_v61 }
 0x2d2   : > { %1579 = vpow2.f32 %v706_v62  ;;  %v386_v62 = vpop.permute.xlu1 %385 }
 0x2d3   : > { %1581 = vpow2.f32 %v708_v63 }
 0x2d4   : > { %1583 = vpow2.f32 %v710_v5  ;;  %v1968_v20 = vpop.eup %1565 }
 0x2d5   : > { %1585 = vpow2.f32 %v712_v9 }
 0x2d6   : > { %v1568_v24 = vpop.eup %1567  ;;  %1587 = vpow2.f32 %v714_v13 }
 0x2d7   : > { %v1570_v45 = vpop.eup %1569  ;;  %1589 = vpow2.f32 %v716_v16  ;;  %v391_v16 = vpop.permute.xlu1 %390 }
 0x2d8   : > { %v1572_v53 = vpop.eup %1571  ;;  %1591 = vpow2.f32 %v718_v18  ;;  %v726_v14 = vadd.f32 %v1570_v45, %v1568_v24  ;;  %v1463_v54 = vpack.c.bf16 %v1570_v45, %v1568_v24 }
 0x2d9   : > { %v1574_v55 = vpop.eup %1573  ;;  %1593 = vpow2.f32 %v720_v22 }
 0x2da   : > { %v1576_v56 = vpop.eup %1575  ;;  %v727_v57 = vadd.f32 %v1572_v53, %v726_v14  ;;  %1464 = vmatpush3.bf16.xpose.msra.mxu1 %v1463_v54  ;;  %v1466_v3 = vpack.c.bf16 %v1574_v55, %v1572_v53  ;;  %1595 = vpow2.f32 %v724_v42 }
 0x2db   : > { %v1578_v8 = vpop.eup %1577  ;;  %1465 = vmatprep.subr.bf16.mxu1 %v1701_v58  ;;  %v401_v42 = vpop.permute.xlu1 %400 }
 0x2dc   : > { %v1580_v12 = vpop.eup %1579  ;;  %v728_v15 = vadd.f32 %v1574_v55, %v727_v57  ;;  %v1469_v17 = vpack.c.bf16 %v1578_v8, %v1576_v56 }
 0x2dd   : > { %v1582_v19 = vpop.eup %1581 }
 0x2de   : > { %v1584_v26 = vpop.eup %1583  ;;  %v729_v43 = vadd.f32 %v1576_v56, %v728_v15  ;;  %v1472_v21 = vpack.c.bf16 %v1582_v19, %v1580_v12 }
 0x2df   : > { %v1586_v23 = vpop.eup %1585  ;;  %v406_v54 = vpop.permute.xlu1 %405 }
 0x2e0   : > { %v1588_v46 = vpop.eup %1587  ;;  %v730_v44 = vadd.f32 %v1578_v8, %v729_v43  ;;  %v1475_v48 = vpack.c.bf16 %v1586_v23, %v1584_v26  ;;  %v426_v43 = vadd.f32 %v1931_v35, %v401_v42 }
 0x2e1   : > { %v1590_v49 = vpop.eup %1589 }
 0x2e2   : > { %v1592_v50 = vpop.eup %1591  ;;  %v731_v51 = vadd.f32 %v1580_v12, %v730_v44  ;;  %1467 = vmatpush3.bf16.xpose.msra.mxu1 %v1466_v3  ;;  %v1478_v52 = vpack.c.bf16 %v1590_v49, %v1588_v46 }
 0x2e3   : > { %v1594_v47 = vpop.eup %1593  ;;  %1468 = vmatprep.subr.bf16.mxu1 %v1701_v58  ;;  %v411_v3 = vpop.permute.xlu1 %410 }
 0x2e4   : > { %v1596_v60 = vpop.eup %1595  ;;  %v732_v59 = vadd.f32 %v1582_v19, %v731_v51  ;;  %v1481_v61 = vpack.c.bf16 %v1594_v47, %v1592_v50  ;;  %v423_v19 = vadd.f32 %v386_v62, %v1929_v34  ;;  %v428_v44 = vadd.f32 %v1935_v37, %v411_v3  ;;  %v880_v37 = vld [vmem:[#allocation2] sm:$0xff] }
 0x2e5   : > { %v1484_v63 = vpack.c.bf16 %v1596_v60, %v1968_v20  ;;  %1430 = vmatprep.mubr.msk.f32.mxu0 %vm229_vm0, %v880_v37 }
 0x2e6   : > { %v733_v5 = vadd.f32 %v1584_v26, %v732_v59  ;;  %v424_v26 = vadd.f32 %v1927_v33, %v391_v16 }
 0x2e7   : > { %v416_v15 = vpop.permute.xlu1 %415 }
 0x2e8   : > { %v734_v9 = vadd.f32 %v1586_v23, %v733_v5 }
 0x2ea   : > { %v735_v13 = vadd.f32 %v1588_v46, %v734_v9  ;;  %1470 = vmatpush3.bf16.xpose.msra.mxu1 %v1469_v17  ;;  %v427_v46 = vadd.f32 %v406_v54, %v1942_v39  ;;  %v1704_v39 = vmov 1  }
 0x2eb   : > { %1471 = vmatprep.subr.bf16.mxu1 %v1701_v58  ;;  %v421_v17 = vpop.permute.xlu1 %420  ;;  %1563 = vset.pattern.permute.xlu1 %v1704_v39 }
 0x2ec   : > { %v736_v18 = vadd.f32 %v1590_v49, %v735_v13  ;;  %v430_v49 = vadd.f32 %v1945_v40, %v421_v17  ;;  %1564 = vset.pattern.permute.xlu0 %v1704_v39  ;;  %897 = vperm.xlu1 %1563, %v1888_v25  }
 0x2ee   : > { %v737_v22 = vadd.f32 %v1592_v50, %v736_v18 }
 0x2f0   : > { %v738_v24 = vadd.f32 %v1594_v47, %v737_v22  ;;  %901 = vperm.xlu1 %1563, %v1894_v27  }
 0x2f2   : > { %v739_v45 = vadd.f32 %v1968_v20, %v738_v24  ;;  %1473 = vmatpush3.bf16.xpose.msra.mxu1 %v1472_v21  ;;  %v396_v20 = vpop.permute.xlu0 %395 }
 0x2f3   : > { %1474 = vmatprep.subr.bf16.mxu1 %v1701_v58  ;;  %v425_v21 = vadd.f32 %v396_v20, %v1933_v36  ;;  %v2117_v36 = vmov 0.0  }
 0x2f4   : > { %v740_v53 = vadd.f32 %v1596_v60, %v739_v45  ;;  %905 = vperm.xlu1 %1563, %v1940_v38  }
 0x2f6   : > { %v741_v14 = vrot.slane %v740_v53, 4 }
 0x2f8   : > { %v742_v55 = vadd.f32 %v741_v14, %v740_v53  ;;  %909 = vperm.xlu1 %1563, %v1900_v28  }
 0x2fa   : > { %1476 = vmatpush3.bf16.xpose.msra.mxu1 %v1475_v48  ;;  %v743_v56 = vrot.slane %v742_v55, 2  ;;  %v429_v48 = vadd.f32 %v416_v15, %v1947_v41 }
 0x2fb   : > { %1477 = vmatprep.subr.bf16.mxu1 %v1701_v58 }
 0x2fc   : > { %v744_v57 = vadd.f32 %v743_v56, %v742_v55  ;;  %913 = vperm.xlu1 %1563, %v1906_v29  }
 0x2fe   : > { %v745_v8 = vrot.slane %v744_v57, 1 }
 0x300   : > { %v746_v12 = vadd.f32 %v745_v8, %v744_v57  ;;  %917 = vperm.xlu1 %1563, %v1912_v30  }
 0x302   : > { %1479 = vmatpush3.bf16.xpose.msra.mxu1 %v1478_v52  ;;  %1597 = vrcp.f32 %v746_v12 }
 0x303   : > { %1480 = vmatprep.subr.bf16.mxu1 %v1701_v58 }
 0x304   : > { %921 = vperm.xlu1 %1563, %v1918_v31  }
 0x308   : > { %925 = vperm.xlu1 %1563, %v1924_v32   ;;  %v868_v32 = vlaneseq }
 0x30a   : > { %1482 = vmatpush3.bf16.xpose.msra.mxu1 %v1481_v61  ;;  %v869_v22 = vshrl.u32 %v868_v32, 7 }
 0x30b   : > { %1483 = vmatprep.subr.bf16.mxu1 %v1701_v58 }
 0x30c   : > { %v1598_v23 = vpop.eup %1597  ;;  %v870_v24 = vsub.s32 0, %v869_v22 }
 0x30d   : > { %v748_v50 = vmul.f32 %v1598_v23, %v423_v19  ;;  %v749_v51 = vmul.f32 %v1598_v23, %v424_v26  ;;  %v750_v34 = vmul.f32 %v1598_v23, %v425_v21  ;;  %v751_v52 = vmul.f32 %v1598_v23, %v426_v43 }
 0x30e   : > { %v752_v33 = vmul.f32 %v1598_v23, %v427_v46  ;;  %v753_v47 = vmul.f32 %v1598_v23, %v428_v44  ;;  %v754_v35 = vmul.f32 %v1598_v23, %v429_v48  ;;  %v755_v60 = vmul.f32 %v1598_v23, %v430_v49  ;;  %v881_v49 = vld [vmem:[#allocation2 + $0x8] sm:$0xff] }
 0x312   : > { %1485 = vmatpush3.bf16.xpose.msra.mxu1 %v1484_v63 }
 0x319   : > { %1388 = vmatmul.mubr.f32.vlgmr.msra.gmra.mrb[0].mxu1 %v748_v50  ;;  %v882_v50 = vld [vmem:[#allocation2 + $0x10] sm:$0xff] }
 0x31a   : > { %1390 = vmatprep.mubr.msk.f32.mxu1 %vm1702_vm2, %v2117_v36 }
 0x31d   : > { %1391 = vmatmul.mubr.f32.gmra.mrb[2].mxu1 %v749_v51  ;;  %v883_v51 = vld [vmem:[#allocation2 + $0x18] sm:$0xff] }
 0x31e   : > { %1393 = vmatprep.mubr.msk.f32.mxu1 %vm1702_vm2, %v2117_v36 }
 0x321   : > { %1394 = vmatmul.mubr.f32.gmra.mrb[4].mxu1 %v750_v34  ;;  %v884_v34 = vld [vmem:[#allocation2 + $0x20] sm:$0xff] }
 0x322   : > { %1396 = vmatprep.mubr.msk.f32.mxu1 %vm1702_vm2, %v2117_v36 }
 0x325   : > { %1397 = vmatmul.mubr.f32.gmra.mrb[6].mxu1 %v751_v52  ;;  %v885_v52 = vld [vmem:[#allocation2 + $0x28] sm:$0xff] }
 0x326   : > { %1399 = vmatprep.mubr.msk.f32.mxu1 %vm1702_vm2, %v2117_v36 }
 0x329   : > { %1400 = vmatmul.mubr.f32.gmra.mrb[8].mxu1 %v752_v33  ;;  %v886_v33 = vld [vmem:[#allocation2 + $0x30] sm:$0xff] }
 0x32a   : > { %1402 = vmatprep.mubr.msk.f32.mxu1 %vm1702_vm2, %v2117_v36 }
 0x32d   : > { %1403 = vmatmul.mubr.f32.gmra.mrb[10].mxu1 %v753_v47  ;;  %v887_v47 = vld [vmem:[#allocation2 + $0x38] sm:$0xff] }
 0x32e   : > { %1405 = vmatprep.mubr.msk.f32.mxu1 %vm1702_vm2, %v2117_v36 }
 0x331   : > { %1406 = vmatmul.mubr.f32.gmra.mrb[12].mxu1 %v754_v35 }
 0x332   : > { %1408 = vmatprep.mubr.msk.f32.mxu1 %vm1702_vm2, %v2117_v36 }
 0x335   : > { %1409 = vmatmul.mubr.f32.gmra.mrb[14].mxu1 %v755_v60 }
 0x336   : > { %1411 = vmatprep.mubr.msk.f32.mxu1 %vm1702_vm2, %v2117_v36 }
 0x339   : > { %1412 = vmatmul.mubr.f32.gmra.mrb[16].mxu1 %v1598_v23 }
 0x36b   : > { %v898_v35 = vpop.permute.xlu1 %897 }
 0x36f   : > { %v902_v60 = vpop.permute.xlu1 %901 }
 0x373   : > { %v906_v36 = vpop.permute.xlu1 %905 }
 0x377   : > { %v910_v37 = vpop.permute.xlu1 %909 }
 0x37b   : > { %v914_v39 = vpop.permute.xlu1 %913 }
 0x3ec   : > { %v822_v40 = vpop.f32.mrb[0].mxu1 }
 0x3ed   : > { %v1389_v41 = vpop.f32.mrb[1].mxu1 }
 0x3f0   : > { %v827_v58 = vpop.f32.mrb[2].mxu1 }
 0x3f1   : > { %v1392_v59 = vpop.f32.mrb[3].mxu1 }
 0x3f4   : > { %v832_v61 = vpop.f32.mrb[4].mxu1 }
 0x3f5   : > { %v1395_v25 = vpop.f32.mrb[5].mxu1 }
 0x3f8   : > { %v837_v62 = vpop.f32.mrb[6].mxu1 }
 0x3f9   : > { %v1398_v27 = vpop.f32.mrb[7].mxu1 }
 0x3fc   : > { %v842_v63 = vpop.f32.mrb[8].mxu1 }
 0x3fd   : > { %v1401_v38 = vpop.f32.mrb[9].mxu1 }
 0x400   : > { %v847_v5 = vpop.f32.mrb[10].mxu1 }
 0x401   : > { %v1404_v28 = vpop.f32.mrb[11].mxu1 }
 0x404   : > { %v852_v9 = vpop.f32.mrb[12].mxu1 }
 0x405   : > { %v1407_v29 = vpop.f32.mrb[13].mxu1 }
 0x408   : > { %v857_v13 = vpop.f32.mrb[14].mxu1 }
 0x409   : > { %v1410_v30 = vpop.f32.mrb[15].mxu1 }
 0x40c   : > { %v862_v16 = vpop.f32.mrb[16].mxu1 }
 0x40d   : > { %v866_v31 = vadd.f32 1e-09, %v862_v16  ;;  %v1413_v18 = vpop.f32.mrb[17].mxu1 }
 0x40f   : > { %1599 = vrcp.f32 %v866_v31 }
 0x419   : > { %v1600_v42 = vpop.eup %1599 }
 0x41a   : > { %v871_v45 = vrot.slane %v1600_v42, %v870_v24 }
 0x41c   : > { %v872_v53 = vmul.f32 %v871_v45, %v822_v40  ;;  %v873_v14 = vmul.f32 %v871_v45, %v827_v58  ;;  %v874_v54 = vmul.f32 %v871_v45, %v832_v61  ;;  %v875_v55 = vmul.f32 %v871_v45, %v837_v62  ;;  %v918_v40 = vpop.permute.xlu1 %917 }
 0x41d   : > { %v876_v56 = vmul.f32 %v871_v45, %v842_v63  ;;  %v877_v57 = vmul.f32 %v871_v45, %v847_v5  ;;  %v878_v3 = vmul.f32 %v871_v45, %v852_v9  ;;  %v879_v8 = vmul.f32 %v871_v45, %v857_v13 }
 0x41e   : > { %v888_v12 = vsub.f32 %v1821_v0, %v872_v53  ;;  %v889_v15 = vsub.f32 %v1823_v1, %v873_v14  ;;  %v890_v20 = vsub.f32 %v1825_v2, %v874_v54  ;;  %v891_v17 = vsub.f32 %v1829_v4, %v875_v55 }
 0x41f   : > { %v892_v19 = vsub.f32 %v1833_v6, %v876_v56  ;;  %v893_v26 = vsub.f32 %v1835_v7, %v877_v57  ;;  %v894_v43 = vsub.f32 %v1843_v10, %v878_v3  ;;  %v895_v21 = vsub.f32 %v1845_v11, %v879_v8 }
 0x420   : > { %v1486_v23 = vpack.c.bf16 %v889_v15, %v888_v12  ;;  %v1490_v46 = vpack.c.bf16 %v891_v17, %v890_v20  ;;  %v922_v28 = vpop.permute.xlu1 %921 }
 0x421   : > { %v1494_v44 = vpack.c.bf16 %v893_v26, %v892_v19  ;;  %v1498_v48 = vpack.c.bf16 %v895_v21, %v894_v43 }
 0x422   : > { %1487 = vmatprep.subr.bf16.mxu0 %v1486_v23 }
 0x423   : > { %1489 = vmatpush3.bf16.msra.mxu0 %v1486_v23 }
 0x424   : > { %1491 = vmatprep.subr.bf16.mxu0 %v1490_v46  ;;  %v926_v24 = vpop.permute.xlu1 %925 }
 0x427   : > { %1493 = vmatpush3.bf16.msra.mxu0 %v1490_v46 }
 0x428   : > { %1495 = vmatprep.subr.bf16.mxu0 %v1494_v44 }
 0x42b   : > { %1497 = vmatpush3.bf16.msra.mxu0 %v1494_v44 }
 0x42c   : > { %1499 = vmatprep.subr.bf16.mxu0 %v1498_v48 }
 0x42f   : > { %1501 = vmatpush3.bf16.msra.mxu0 %v1498_v48 }
 0x432   : > { %1431 = vmatmul.mubr.msk.f32.vlgmr.msra.gmra.mrb[26].mxu0 %vm229_vm0, %v881_v49 }
 0x433   : > { %1433 = vmatprep.mubr.msk.f32.mxu0 %vm229_vm0, %v882_v50 }
 0x436   : > { %1434 = vmatmul.mubr.msk.f32.gmra.mrb[28].mxu0 %vm229_vm0, %v883_v51 }
 0x437   : > { %1436 = vmatprep.mubr.msk.f32.mxu0 %vm229_vm0, %v884_v34 }
 0x43a   : > { %1437 = vmatmul.mubr.msk.f32.gmra.mrb[30].mxu0 %vm229_vm0, %v885_v52 }
 0x43b   : > { %1439 = vmatprep.mubr.msk.f32.mxu0 %vm229_vm0, %v886_v33 }
 0x43e   : > { %1440 = vmatmul.mubr.msk.f32.gmra.mrb[32].mxu0 %vm229_vm0, %v887_v47 }
 0x505   : > { %v1432_v41 = vpop.f32.mrb[26].mxu0 }
 0x506   : > { %v1024_v58 = vadd.f32 %v1432_v41, %v902_v60  ;;  %v1018_v59 = vpop.f32.mrb[27].mxu0 }
 0x507   : > { %v1019_v61 = vadd.f32 %v1018_v59, %v898_v35 }
 0x508   : > { %v1058_v25 = vmax.f32 %v1024_v58, 0.0 }
 0x509   : > { %v1057_v62 = vmax.f32 %v1019_v61, 0.0  ;;  %v1435_v27 = vpop.f32.mrb[28].mxu0 }
 0x50a   : > { %v1066_v63 = vadd.f32 %v1058_v25, %v1823_v1  ;;  %v1034_v38 = vadd.f32 %v1435_v27, %v910_v37  ;;  %v1028_v5 = vpop.f32.mrb[29].mxu0 }
 0x50b   : > { %v1065_v9 = vadd.f32 %v1057_v62, %v1821_v0  ;;  %v1029_v29 = vadd.f32 %v1028_v5, %v906_v36 }
 0x50c   : > { %1074 = vst [vmem:[%s2032_s9 + $0x8] sm:$0xff] %v1066_v63  ;;  %v1060_v13 = vmax.f32 %v1034_v38, 0.0 }
 0x50d   : > { %1073 = vst [vmem:[%s2032_s9] sm:$0xff] %v1065_v9  ;;  %v1059_v30 = vmax.f32 %v1029_v29, 0.0  ;;  %v1438_v16 = vpop.f32.mrb[30].mxu0 }
 0x50e   : > { %v1068_v1 = vadd.f32 %v1060_v13, %v1829_v4  ;;  %v1044_v31 = vadd.f32 %v1438_v16, %v918_v40  ;;  %v1038_v18 = vpop.f32.mrb[31].mxu0 }
 0x50f   : > { %v1067_v0 = vadd.f32 %v1059_v30, %v1825_v2  ;;  %v1039_v32 = vadd.f32 %v1038_v18, %v914_v39 }
 0x510   : > { %1076 = vst [vmem:[%s2032_s9 + $0x18] sm:$0xff] %v1068_v1  ;;  %v1062_v22 = vmax.f32 %v1044_v31, 0.0 }
 0x511   : > { %1075 = vst [vmem:[%s2032_s9 + $0x10] sm:$0xff] %v1067_v0  ;;  %v1061_v42 = vmax.f32 %v1039_v32, 0.0  ;;  %v1441_v45 = vpop.f32.mrb[32].mxu0 }
 0x512   : > { %v1070_v53 = vadd.f32 %v1062_v22, %v1835_v7  ;;  %v1054_v14 = vadd.f32 %v1441_v45, %v926_v24  ;;  %v1048_v4 = vpop.f32.mrb[33].mxu0 }
 0x513   : > { %v1069_v54 = vadd.f32 %v1061_v42, %v1833_v6  ;;  %v1049_v2 = vadd.f32 %v1048_v4, %v922_v28 }
 0x514   : > { %1078 = vst [vmem:[%s2032_s9 + $0x28] sm:$0xff] %v1070_v53  ;;  %v1064_v55 = vmax.f32 %v1054_v14, 0.0 }
 0x515   : > { %1077 = vst [vmem:[%s2032_s9 + $0x20] sm:$0xff] %v1069_v54  ;;  %v1063_v56 = vmax.f32 %v1049_v2, 0.0 }
 0x516   : > { %v1072_v7 = vadd.f32 %v1064_v55, %v1845_v11 }
 0x517   : > { %v1071_v57 = vadd.f32 %v1063_v56, %v1843_v10 }
 0x518   : > { %1080 = vst [vmem:[%s2032_s9 + $0x38] sm:$0xff] %v1072_v7 }
 0x519   : > { %1079 = vst [vmem:[%s2032_s9 + $0x30] sm:$0xff] %v1071_v57 }
 0x51a   : > { %1642 = shalt.err (!%p1639_p7)
}
 0x51b   : > { %s1643_s5 = scalar_lea.hbm %s2053_s14, 1024  ;;  %s1647_s27 = scalar_lea.hbm %s2104_s4, 2048 }
 0x51c   : > { %p1644_p8 = scmp.ne.s32.totalorder %s2053_s14, %s1643_s5  ;;  %p1648_p1 = scmp.lt.u32.totalorder %s2053_s14, %s2104_s4 }
 0x51d   : > { %p1649_p0 = scmp.lt.u32.totalorder %s1647_s27, %s1643_s5  ;;  %p1651_p6 = scmp.lt.u32.totalorder %s1643_s5, %s2053_s14 }
 0x51e   : > { %p1645_p11 = pnand %p1644_p8, %p2118_p9 }
 0x51f   : > { %p1650_p5 = por %p1649_p0, %p1648_p1 }
 0x520   : > { %p1646_p13 = pneg %p1645_p11 }
 0x521   : > { %p1652_p10 = por %p1651_p6, %p1650_p5 }
 0x523   : > { %p1653_p12 = pnand %p1652_p10, %p1646_p13 }
 0x525   : > { %1656 = shalt.err (!%p1653_p12)
}
 0x526   : > { %s1706_s8 = smov 128   ;;  %s1707_s9 = smov 8  }
 0x527   : > { %1506 = dma.vmem_to_hbm [thread:$0]  (%p2118_p9), %s2046_s10, 1024, %s2053_s14, %s2059_s19, %s1706_s8, %s1706_s8, %s1707_s9  }
 0x528 PF: > { %p1518_p2 = scmp.ge.s32.totalorder %s1695_s18, 2  ;;  %s1110_s11 = sand.u32 1, %s1683_s15  }
 0x529   : > { %p2119_p3 = scmp.ne.s32.totalorder %s2111_s26, 0  ;;  %s1111_s12 = scalar_lea.sflag [#allocation4], %s1110_s11 }
 0x52b   : > { %p1513_p4 = pnand %p1518_p2, %p2119_p3 }
 0x52d   : > { %1678 = dma.done.wait (!%p1513_p4), %s1111_s12, 1024  }
 0x52e   : > { %1680 = vsyncadd (!%p1513_p4), %s1111_s12, 4294966272  ;;  %p15_p7 = scmp.ge.s32.totalorder %s1758_s21, 4   ;;  %s2120_s15 = smov %s1687_s16 }
 0x52f   : > { %s2121_s16 = smov %s1691_s17  ;;  %s2122_s17 = smov %s1769_s24 }
 0x530   : > { %s2123_s18 = smov %s1758_s21  ;;  %17 = sbr.rel (!%p15_p7) target bundleno = 4 (0x4), region = 76 }
 0x537   :  { %1116 = vsyncpa [#allocation3], 1 }
 0x538   :  { %1118 = vsyncpa [#allocation3 + $0x1], 1 }
 0x539   :  { %1119 = vsyncpa [#allocation4], 1 }
 0x53a   :  { %1121 = vsyncpa [#allocation4 + $0x1], 1 }

</bundles_post_ra>
